<compile_context>
chip_gen: v6e
topology: v6e:2x2x1
jax: 0.10.0
libtpu: 0.0.40
codegen_flags: <defaults>
</compile_context>

<pallas_src>
import jax
import jax.numpy as jnp
from jax.experimental import pallas as pl
from jax.experimental.pallas import tpu as pltpu

BN_EPS = 1e-5


def _round_up(x, m):
    return (x + m - 1) // m * m


def _cdiv(a, b):
    return (a + b - 1) // b


# ---------------- pass 1: conv-as-matmul + per-tile BN partial stats ----------------
def _conv_stats_kernel(patches_ref, w_ref, y_ref, stats_ref):
    # MXU matmul with f32 accumulation (operands kept f32 to preserve module semantics).
    y = jnp.dot(patches_ref[...], w_ref[...], preferred_element_type=jnp.float32)
    y_ref[...] = y
    ssum = jnp.sum(y, axis=0, keepdims=True)          # (1, Cp)  partial sum
    ssq = jnp.sum(y * y, axis=0, keepdims=True)       # (1, Cp)  partial sum of squares
    pad = jnp.zeros((6, y.shape[1]), jnp.float32)
    stats_ref[...] = jnp.concatenate([ssum, ssq, pad], axis=0)   # (8, Cp) sublane-aligned


# ---------------- pass 2: fused BN affine + ReLU ----------------
def _bn_relu_kernel(y_ref, scale_ref, shift_ref, out_ref):
    out_ref[...] = jnp.maximum(
        y_ref[...] * scale_ref[...] + shift_ref[...], 0.0
    ).astype(out_ref.dtype)


def _pick_tile_m(k, cp, vmem_budget_bytes=24 * 1024 * 1024):
    """Largest row tile (multiple of 8) whose double-buffered working set fits the budget."""
    tm = 1024
    while tm > 8:
        # 2x patches tile + 2x y tile + 2x out/y tile + resident weight + stats, f32
        ws = (2 * tm * k + 4 * tm * cp + 2 * k * cp + 2 * 8 * cp) * 4
        if ws <= vmem_budget_bytes:
            break
        tm //= 2
    return max(tm, 8)


def conv_block_forward(x_nchw, w_oihw, bias, gamma, beta):
    """x_nchw: (N, Cin, H, W) float32. Returns (N, Cout, H, W) float32."""
    del bias  # exactly cancelled by the training-mode BatchNorm mean subtraction
    N, Cin, H, W = x_nchw.shape
    Cout, _, KH, KW = w_oihw.shape
    assert KH == 3 and KW == 3

    # ---- glue: im2col in NHWC with zero padding=1, stride=1 ----
    # TODO(synk): replace the HBM im2col (9x input-byte blow-up) with an in-kernel
    # halo-DMA + 9 shifted-matmul accumulation when Cin is large enough to matter.
    x_nhwc = jnp.transpose(x_nchw, (0, 2, 3, 1)).astype(jnp.float32)       # (N,H,W,Cin)
    x_pad = jnp.pad(x_nhwc, ((0, 0), (1, 1), (1, 1), (0, 0)))              # (N,H+2,W+2,Cin)
    shifts = [x_pad[:, kh:kh + H, kw:kw + W, :]
              for kh in range(KH) for kw in range(KW)]
    patches = jnp.stack(shifts, axis=3).reshape(N * H * W, KH * KW * Cin)  # (M, K)

    M, K = patches.shape
    Cp = _round_up(Cout, 128)   # lane-dense output columns / MXU N-dim fill

    # weight (Cout,Cin,KH,KW) -> (KH,KW,Cin,Cout) -> (K,Cout) -> zero-pad to (K,Cp)
    w_mat = jnp.transpose(w_oihw, (2, 3, 1, 0)).reshape(K, Cout).astype(jnp.float32)
    w_mat = jnp.pad(w_mat, ((0, 0), (0, Cp - Cout)))
    gamma_p = jnp.pad(gamma.astype(jnp.float32), (0, Cp - Cout), constant_values=1.0)
    beta_p = jnp.pad(beta.astype(jnp.float32), (0, Cp - Cout))

    # ---- row tiling over M (fully parallel grid axis -> pipelining + megacore) ----
    TM = _pick_tile_m(K, Cp)
    TM = min(TM, max(8, _round_up(_cdiv(M, 2), 8)))   # keep >= 2 tiles when M allows
    M_pad = _round_up(M, TM)
    if M_pad != M:
        # zero rows produce y == 0 (bias dropped) -> contribute nothing to the stats
        patches = jnp.pad(patches, ((0, M_pad - M), (0, 0)))
    num_tiles = M_pad // TM

    vmem_limit = int(min(max((2 * TM * K + 4 * TM * Cp + 2 * K * Cp) * 4 * 2,
                             16 * 1024 * 1024),
                         48 * 1024 * 1024))
    cparams = pltpu.CompilerParams(
        dimension_semantics=("parallel",), vmem_limit_bytes=vmem_limit)

    # ---- pass 1: y = patches @ W, per-tile partial channel stats ----
    y_flat, stats = pl.pallas_call(
        _conv_stats_kernel,
        out_shape=(jax.ShapeDtypeStruct((M_pad, Cp), jnp.float32),
                   jax.ShapeDtypeStruct((num_tiles * 8, Cp), jnp.float32)),
        grid=(num_tiles,),
        in_specs=[
            pl.BlockSpec((TM, K), lambda i: (i, 0)),
            pl.BlockSpec((K, Cp), lambda i: (0, 0)),       # weight stays resident
        ],
        out_specs=(
            pl.BlockSpec((TM, Cp), lambda i: (i, 0)),
            pl.BlockSpec((8, Cp), lambda i: (i, 0)),
        ),
        compiler_params=cparams,
    )(patches, w_mat)

    # ---- tiny per-channel combine (biased variance, as torch training-mode BN) ----
    stats = stats.reshape(num_tiles, 8, Cp)
    ssum = jnp.sum(stats[:, 0, :], axis=0)
    ssq = jnp.sum(stats[:, 1, :], axis=0)
    mean = ssum / M
    var = jnp.maximum(ssq / M - mean * mean, 0.0)
    scale = gamma_p * jax.lax.rsqrt(var + BN_EPS)
    shift = beta_p - mean * scale

    # ---- pass 2: fused affine + ReLU over the same row tiles ----
    out_flat = pl.pallas_call(
        _bn_relu_kernel,
        out_shape=jax.ShapeDtypeStruct((M_pad, Cp), jnp.float32),
        grid=(num_tiles,),
        in_specs=[
            pl.BlockSpec((TM, Cp), lambda i: (i, 0)),
            pl.BlockSpec((1, Cp), lambda i: (0, 0)),
            pl.BlockSpec((1, Cp), lambda i: (0, 0)),
        ],
        out_specs=pl.BlockSpec((TM, Cp), lambda i: (i, 0)),
        compiler_params=cparams,
    )(y_flat, scale.reshape(1, Cp), shift.reshape(1, Cp))

    out_nhwc = out_flat[:M, :Cout].reshape(N, H, W, Cout)
    return jnp.transpose(out_nhwc, (0, 3, 1, 2))                           # back to NCHW


def _reference(x, w, b, gamma, beta):
    """Pure-JAX reference: Conv2d(3x3,s1,p1) + bias -> training-mode BN -> ReLU."""
    y = jax.lax.conv_general_dilated(
        x, w, window_strides=(1, 1), padding=((1, 1), (1, 1)),
        dimension_numbers=("NCHW", "OIHW", "NCHW"),
        precision=jax.lax.Precision.HIGHEST)
    y = y + b.reshape(1, -1, 1, 1)
    mean = jnp.mean(y, axis=(0, 2, 3), keepdims=True)
    var = jnp.mean((y - mean) ** 2, axis=(0, 2, 3), keepdims=True)
    y_hat = (y - mean) * jax.lax.rsqrt(var + BN_EPS)
    return jnp.maximum(y_hat * gamma.reshape(1, -1, 1, 1) + beta.reshape(1, -1, 1, 1), 0.0)


if __name__ == "__main__":
    key = jax.random.PRNGKey(0)
    k_x, k_w, k_b = jax.random.split(key, 3)

    N, Cin, H, W = 2, 4, 16, 16
    Cout, KH, KW = 8, 3, 3

    x = jax.random.normal(k_x, (N, Cin, H, W), dtype=jnp.float32)

    # deterministic parameter init (roughly mimicking PyTorch defaults)
    fan_in = Cin * KH * KW
    bound = 1.0 / (fan_in ** 0.5)
    w = jax.random.uniform(k_w, (Cout, Cin, KH, KW), minval=-bound, maxval=bound,
                           dtype=jnp.float32)
    b = jax.random.uniform(k_b, (Cout,), minval=-bound, maxval=bound, dtype=jnp.float32)
    gamma = jnp.ones((Cout,), jnp.float32)
    beta = jnp.zeros((Cout,), jnp.float32)

    out = jax.jit(conv_block_forward)(x, w, b, gamma, beta)
    jax.block_until_ready(out)
    assert out.shape == (N, Cout, H, W)

    ref = _reference(x, w, b, gamma, beta)
    err = float(jnp.max(jnp.abs(out - ref)))
    assert err < 2e-3, f"max abs err vs reference: {err}"
    print("KERNEL_OK")
</pallas_src>

<mosaic_0001>
module attributes {stable_mosaic.version = 11 : i64} {
  func.func @_conv_stats_kernel(%arg0: i32, %arg1: memref<256x36xf32, #tpu.memory_space<vmem>>, %arg2: memref<36x128xf32, #tpu.memory_space<vmem>>, %arg3: memref<256x128xf32, #tpu.memory_space<vmem>>, %arg4: memref<8x128xf32, #tpu.memory_space<vmem>>) attributes {dimension_semantics = [#tpu.dimension_semantics<parallel>], iteration_bounds = array<i64: 2>, scalar_prefetch = 0 : i64, scratch_operands = 0 : i64, tpu.core_type = #tpu.core_type<tc>, window_params = [{transform_indices = @transform_0, window_bounds = array<i64: 256, 36>}, {pipeline_mode = #tpu.pipeline_mode<synchronous>, transform_indices = @transform_1, window_bounds = array<i64: 36, 128>}, {transform_indices = @transform_2, window_bounds = array<i64: 256, 128>}, {transform_indices = @transform_3, window_bounds = array<i64: 8, 128>}]} {
    %c0 = arith.constant 0 : index
    %c0_0 = arith.constant 0 : index
    %0 = vector.load %arg1[%c0, %c0_0] : memref<256x36xf32, #tpu.memory_space<vmem>>, vector<256x36xf32>
    %c0_1 = arith.constant 0 : index
    %c0_2 = arith.constant 0 : index
    %1 = vector.load %arg2[%c0_1, %c0_2] : memref<36x128xf32, #tpu.memory_space<vmem>>, vector<36x128xf32>
    %cst = arith.constant dense<0.000000e+00> : vector<256x128xf32>
    %2 = tpu.matmul %0, %1, %cst {dimension_numbers = #tpu.dot_dimension_numbers<[1], [0], [0], [1], [0, 0, 1, 1], [], []>} : vector<256x36xf32>, vector<36x128xf32>, vector<256x128xf32> -> vector<256x128xf32>
    %c0_3 = arith.constant 0 : index
    %c0_4 = arith.constant 0 : index
    %3 = vector.load %arg3[%c0_3, %c0_4] : memref<256x128xf32, #tpu.memory_space<vmem>>, vector<256x128xf32>
    tpu.vector_store %arg3[%c0_3, %c0_4], %2 {strides = array<i32>} : memref<256x128xf32, #tpu.memory_space<vmem>>, vector<256x128xf32>,
    %cst_5 = arith.constant dense<0.000000e+00> : vector<128xf32>
    %4 = vector.multi_reduction <add>, %2, %cst_5 [0] : vector<256x128xf32> to vector<128xf32>
    %5 = vector.shape_cast %4 : vector<128xf32> to vector<1x128xf32>
    %6 = arith.mulf %2, %2 : vector<256x128xf32>
    %cst_6 = arith.constant dense<0.000000e+00> : vector<128xf32>
    %7 = vector.multi_reduction <add>, %6, %cst_6 [0] : vector<256x128xf32> to vector<128xf32>
    %8 = vector.shape_cast %7 : vector<128xf32> to vector<1x128xf32>
    %cst_7 = arith.constant 0.000000e+00 : f32
    %9 = vector.broadcast %cst_7 : f32 to vector<6x128xf32>
    %10 = tpu.concatenate %5, %8, %9 in 0 : vector<1x128xf32>, vector<1x128xf32>, vector<6x128xf32> -> vector<8x128xf32>
    %c0_8 = arith.constant 0 : index
    %c0_9 = arith.constant 0 : index
    %11 = vector.load %arg4[%c0_8, %c0_9] : memref<8x128xf32, #tpu.memory_space<vmem>>, vector<8x128xf32>
    tpu.vector_store %arg4[%c0_8, %c0_9], %10 {strides = array<i32>} : memref<8x128xf32, #tpu.memory_space<vmem>>, vector<8x128xf32>,
    return
  }
  func.func @transform_0(%arg0: i32) -> (i32, i32) {
    %c0_i32 = arith.constant 0 : i32
    %c0_i32_0 = arith.constant 0 : i32
    return %arg0, %c0_i32 : i32, i32
  }
  func.func @transform_1(%arg0: i32) -> (i32, i32) {
    %c0_i32 = arith.constant 0 : i32
    %c0_i32_0 = arith.constant 0 : i32
    %c0_i32_1 = arith.constant 0 : i32
    return %c0_i32, %c0_i32_0 : i32, i32
  }
  func.func @transform_2(%arg0: i32) -> (i32, i32) {
    %c0_i32 = arith.constant 0 : i32
    %c0_i32_0 = arith.constant 0 : i32
    return %arg0, %c0_i32 : i32, i32
  }
  func.func @transform_3(%arg0: i32) -> (i32, i32) {
    %c0_i32 = arith.constant 0 : i32
    %c0_i32_0 = arith.constant 0 : i32
    return %arg0, %c0_i32 : i32, i32
  }
}

module attributes {stable_mosaic.version = 11 : i64} {
  func.func @_bn_relu_kernel(%arg0: i32, %arg1: memref<256x128xf32, #tpu.memory_space<vmem>>, %arg2: memref<1x128xf32, #tpu.memory_space<vmem>>, %arg3: memref<1x128xf32, #tpu.memory_space<vmem>>, %arg4: memref<256x128xf32, #tpu.memory_space<vmem>>) attributes {dimension_semantics = [#tpu.dimension_semantics<parallel>], iteration_bounds = array<i64: 2>, scalar_prefetch = 0 : i64, scratch_operands = 0 : i64, tpu.core_type = #tpu.core_type<tc>, window_params = [{transform_indices = @transform_0, window_bounds = array<i64: 256, 128>}, {pipeline_mode = #tpu.pipeline_mode<synchronous>, transform_indices = @transform_1, window_bounds = array<i64: 1, 128>}, {pipeline_mode = #tpu.pipeline_mode<synchronous>, transform_indices = @transform_2, window_bounds = array<i64: 1, 128>}, {transform_indices = @transform_3, window_bounds = array<i64: 256, 128>}]} {
    %c0 = arith.constant 0 : index
    %c0_0 = arith.constant 0 : index
    %0 = vector.load %arg1[%c0, %c0_0] : memref<256x128xf32, #tpu.memory_space<vmem>>, vector<256x128xf32>
    %c0_1 = arith.constant 0 : index
    %c0_2 = arith.constant 0 : index
    %1 = vector.load %arg2[%c0_1, %c0_2] : memref<1x128xf32, #tpu.memory_space<vmem>>, vector<1x128xf32>
    %2 = vector.broadcast %1 : vector<1x128xf32> to vector<256x128xf32>
    %3 = arith.mulf %0, %2 : vector<256x128xf32>
    %c0_3 = arith.constant 0 : index
    %c0_4 = arith.constant 0 : index
    %4 = vector.load %arg3[%c0_3, %c0_4] : memref<1x128xf32, #tpu.memory_space<vmem>>, vector<1x128xf32>
    %5 = vector.broadcast %4 : vector<1x128xf32> to vector<256x128xf32>
    %6 = arith.addf %3, %5 : vector<256x128xf32>
    %cst = arith.constant 0.000000e+00 : f32
    %7 = vector.broadcast %cst : f32 to vector<256x128xf32>
    %8 = arith.maximumf %6, %7 : vector<256x128xf32>
    %c0_5 = arith.constant 0 : index
    %c0_6 = arith.constant 0 : index
    %9 = vector.load %arg4[%c0_5, %c0_6] : memref<256x128xf32, #tpu.memory_space<vmem>>, vector<256x128xf32>
    tpu.vector_store %arg4[%c0_5, %c0_6], %8 {strides = array<i32>} : memref<256x128xf32, #tpu.memory_space<vmem>>, vector<256x128xf32>,
    return
  }
  func.func @transform_0(%arg0: i32) -> (i32, i32) {
    %c0_i32 = arith.constant 0 : i32
    %c0_i32_0 = arith.constant 0 : i32
    return %arg0, %c0_i32 : i32, i32
  }
  func.func @transform_1(%arg0: i32) -> (i32, i32) {
    %c0_i32 = arith.constant 0 : i32
    %c0_i32_0 = arith.constant 0 : i32
    %c0_i32_1 = arith.constant 0 : i32
    return %c0_i32, %c0_i32_0 : i32, i32
  }
  func.func @transform_2(%arg0: i32) -> (i32, i32) {
    %c0_i32 = arith.constant 0 : i32
    %c0_i32_0 = arith.constant 0 : i32
    %c0_i32_1 = arith.constant 0 : i32
    return %c0_i32, %c0_i32_0 : i32, i32
  }
  func.func @transform_3(%arg0: i32) -> (i32, i32) {
    %c0_i32 = arith.constant 0 : i32
    %c0_i32_0 = arith.constant 0 : i32
    return %arg0, %c0_i32 : i32, i32
  }
}

</mosaic_0001>

<bundles_post_ra>
// kernel: conv_block_forward.3
= control target key start
LH: loop header
LB: loop body
LE: loop exit
PB: predicated region body
PF: predicated region fallthrough
CT: control target
= control target key end

     0   :  { %s453_s12 = smov 0   ;;  %s612_s0 = inlined_call_operand.vmem [shape: f32[512,128], index: 0, kind: input, shape index: {}]   ;;  %s613_s1 = inlined_call_operand.vmem [shape: f32[1,128], index: 1, kind: input, shape index: {}]   ;;  %s614_s2 = inlined_call_operand.vmem [shape: f32[1,128], index: 2, kind: input, shape index: {}]   ;;  %s615_s3 = inlined_call_operand.vmem [shape: f32[512,128], index: 3, kind: output, shape index: {}]  }
   0x1 LB: > { %s404_s13 = sadd.s32 4294967295, %s431_s12   ;;  %p408_p0 = scmp.ge.s32.totalorder %s431_s12, 1  ;;  %s431_s12 = sphi %s453_s12, %s13_s12  }
   0x2   : > { %p138_p1 = scmp.lt.s32.totalorder %s431_s12, 3 }
   0x4   : > { %p139_p2 = pnand %p408_p0, %p138_p1 }
   0x5   : > { %s409_s14 = sshll.u32 (!%p139_p2), %s404_s13, 5 }
   0x6   : > { %142 = sbr.rel (%p139_p2) target bundleno = 44 (0x2c), region = 32  ;;  %p163_p3 = scmp.lt.s32.totalorder (!%p139_p2), %s409_s14, 63 }
   0xb   : > { %s617_s14 = smov (!%p163_p3, %s409_s14), 63  ;;  %v464_v0 = vld [vmem:[%s613_s1] ss:$0 sm:$0xff] }
   0xc   : > { %s410_s15 = sshll.u32 %s617_s14, 3  ;;  %v474_v1 = vld [vmem:[%s614_s2] ss:$0 sm:$0xff] }
   0xd   : > { %s469_s20 = scalar_lea.vmem %s612_s0, %s410_s15  ;;  %s497_s25 = scalar_lea.vmem %s615_s3, %s410_s15 }
   0xe   : > { %v174_v2 = vld [vmem:[%s469_s20] sm:$0xff]  ;;  %v175_v3 = vld [vmem:[%s469_s20 + $0x8] sm:$0xff]  ;;  %v176_v4 = vld [vmem:[%s469_s20 + $0x10] sm:$0xff] }
   0xf   : > { %v213_v5 = vmul.f32 %v464_v0, %v174_v2  ;;  %v214_v6 = vmul.f32 %v464_v0, %v175_v3  ;;  %v215_v7 = vmul.f32 %v464_v0, %v176_v4  ;;  %v177_v8 = vld [vmem:[%s469_s20 + $0x18] sm:$0xff]  ;;  %v178_v9 = vld [vmem:[%s469_s20 + $0x20] sm:$0xff]  ;;  %v179_v10 = vld [vmem:[%s469_s20 + $0x28] sm:$0xff] }
  0x10   : > { %v216_v11 = vmul.f32 %v464_v0, %v177_v8  ;;  %v217_v12 = vmul.f32 %v464_v0, %v178_v9  ;;  %v218_v13 = vmul.f32 %v464_v0, %v179_v10  ;;  %v180_v14 = vld [vmem:[%s469_s20 + $0x30] sm:$0xff]  ;;  %v181_v15 = vld [vmem:[%s469_s20 + $0x38] sm:$0xff]  ;;  %v182_v24 = vld [vmem:[%s469_s20 + $0x40] sm:$0xff] }
  0x11   : > { %v252_v16 = vadd.f32 %v474_v1, %v213_v5  ;;  %v253_v17 = vadd.f32 %v474_v1, %v214_v6  ;;  %v254_v18 = vadd.f32 %v474_v1, %v215_v7  ;;  %v219_v19 = vmul.f32 %v464_v0, %v180_v14  ;;  %v183_v25 = vld [vmem:[%s469_s20 + $0x48] sm:$0xff]  ;;  %v184_v26 = vld [vmem:[%s469_s20 + $0x50] sm:$0xff]  ;;  %v185_v31 = vld [vmem:[%s469_s20 + $0x58] sm:$0xff] }
  0x12   : > { %v255_v20 = vadd.f32 %v474_v1, %v216_v11  ;;  %v256_v21 = vadd.f32 %v474_v1, %v217_v12  ;;  %v257_v22 = vadd.f32 %v474_v1, %v218_v13  ;;  %v220_v23 = vmul.f32 %v464_v0, %v181_v15  ;;  %v186_v32 = vld [vmem:[%s469_s20 + $0x60] sm:$0xff]  ;;  %v187_v33 = vld [vmem:[%s469_s20 + $0x68] sm:$0xff]  ;;  %v188_v38 = vld [vmem:[%s469_s20 + $0x70] sm:$0xff] }
  0x13   : > { %v284_v27 = vmax.f32 %v252_v16, 0.0  ;;  %v285_v28 = vmax.f32 %v253_v17, 0.0  ;;  %v286_v29 = vmax.f32 %v254_v18, 0.0  ;;  %v258_v30 = vadd.f32 %v474_v1, %v219_v19  ;;  %v189_v43 = vld [vmem:[%s469_s20 + $0x78] sm:$0xff]  ;;  %v190_v56 = vld [vmem:[%s469_s20 + $0x80] sm:$0xff]  ;;  %v191_v57 = vld [vmem:[%s469_s20 + $0x88] sm:$0xff] }
  0x14   : > { %v287_v34 = vmax.f32 %v255_v20, 0.0  ;;  %v288_v35 = vmax.f32 %v256_v21, 0.0  ;;  %v289_v36 = vmax.f32 %v257_v22, 0.0  ;;  %v259_v37 = vadd.f32 %v474_v1, %v220_v23  ;;  %v192_v58 = vld [vmem:[%s469_s20 + $0x90] sm:$0xff]  ;;  %v193_v63 = vld [vmem:[%s469_s20 + $0x98] sm:$0xff]  ;;  %v194_v2 = vld [vmem:[%s469_s20 + $0xa0] sm:$0xff] }
  0x15   : > { %316 = vst [vmem:[%s497_s25] sm:$0xff] %v284_v27  ;;  %317 = vst [vmem:[%s497_s25 + $0x8] sm:$0xff] %v285_v28  ;;  %v290_v39 = vmax.f32 %v258_v30, 0.0  ;;  %v221_v40 = vmul.f32 %v464_v0, %v182_v24  ;;  %v222_v41 = vmul.f32 %v464_v0, %v183_v25  ;;  %v223_v42 = vmul.f32 %v464_v0, %v184_v26  ;;  %v195_v3 = vld [vmem:[%s469_s20 + $0xa8] sm:$0xff]  ;;  %v196_v8 = vld [vmem:[%s469_s20 + $0xb0] sm:$0xff] }
  0x16   : > { %318 = vst [vmem:[%s497_s25 + $0x10] sm:$0xff] %v286_v29  ;;  %319 = vst [vmem:[%s497_s25 + $0x18] sm:$0xff] %v287_v34  ;;  %v291_v44 = vmax.f32 %v259_v37, 0.0  ;;  %v224_v45 = vmul.f32 %v464_v0, %v185_v31  ;;  %v225_v46 = vmul.f32 %v464_v0, %v186_v32  ;;  %v226_v47 = vmul.f32 %v464_v0, %v187_v33  ;;  %v197_v13 = vld [vmem:[%s469_s20 + $0xb8] sm:$0xff]  ;;  %v198_v26 = vld [vmem:[%s469_s20 + $0xc0] sm:$0xff] }
  0x17   : > { %320 = vst [vmem:[%s497_s25 + $0x20] sm:$0xff] %v288_v35  ;;  %321 = vst [vmem:[%s497_s25 + $0x28] sm:$0xff] %v289_v36  ;;  %v260_v48 = vadd.f32 %v474_v1, %v221_v40  ;;  %v261_v49 = vadd.f32 %v474_v1, %v222_v41  ;;  %v262_v50 = vadd.f32 %v474_v1, %v223_v42  ;;  %v199_v27 = vld [vmem:[%s469_s20 + $0xc8] sm:$0xff]  ;;  %v200_v28 = vld [vmem:[%s469_s20 + $0xd0] sm:$0xff] }
  0x18   : > { %322 = vst [vmem:[%s497_s25 + $0x30] sm:$0xff] %v290_v39  ;;  %v227_v51 = vmul.f32 %v464_v0, %v188_v38  ;;  %323 = vst [vmem:[%s497_s25 + $0x38] sm:$0xff] %v291_v44  ;;  %v263_v52 = vadd.f32 %v474_v1, %v224_v45  ;;  %v264_v53 = vadd.f32 %v474_v1, %v225_v46  ;;  %v201_v33 = vld [vmem:[%s469_s20 + $0xd8] sm:$0xff]  ;;  %v202_v34 = vld [vmem:[%s469_s20 + $0xe0] sm:$0xff] }
  0x19   : > { %v265_v54 = vadd.f32 %v474_v1, %v226_v47  ;;  %v228_v55 = vmul.f32 %v464_v0, %v189_v43  ;;  %v292_v59 = vmax.f32 %v260_v48, 0.0  ;;  %v293_v60 = vmax.f32 %v261_v49, 0.0  ;;  %v203_v35 = vld [vmem:[%s469_s20 + $0xe8] sm:$0xff]  ;;  %v204_v40 = vld [vmem:[%s469_s20 + $0xf0] sm:$0xff]  ;;  %v205_v45 = vld [vmem:[%s469_s20 + $0xf8] sm:$0xff] }
  0x1a   : > { %v294_v61 = vmax.f32 %v262_v50, 0.0  ;;  %v266_v62 = vadd.f32 %v474_v1, %v227_v51  ;;  %v295_v4 = vmax.f32 %v263_v52, 0.0  ;;  %v296_v5 = vmax.f32 %v264_v53, 0.0 }
  0x1b   : > { %v297_v6 = vmax.f32 %v265_v54, 0.0  ;;  %v267_v7 = vadd.f32 %v474_v1, %v228_v55  ;;  %324 = vst [vmem:[%s497_s25 + $0x40] sm:$0xff] %v292_v59  ;;  %325 = vst [vmem:[%s497_s25 + $0x48] sm:$0xff] %v293_v60  ;;  %v229_v10 = vmul.f32 %v464_v0, %v190_v56  ;;  %v230_v11 = vmul.f32 %v464_v0, %v191_v57 }
  0x1c   : > { %326 = vst [vmem:[%s497_s25 + $0x50] sm:$0xff] %v294_v61  ;;  %v298_v9 = vmax.f32 %v266_v62, 0.0  ;;  %v231_v12 = vmul.f32 %v464_v0, %v192_v58  ;;  %327 = vst [vmem:[%s497_s25 + $0x58] sm:$0xff] %v295_v4  ;;  %v232_v15 = vmul.f32 %v464_v0, %v193_v63  ;;  %v233_v16 = vmul.f32 %v464_v0, %v194_v2 }
  0x1d   : > { %328 = vst [vmem:[%s497_s25 + $0x60] sm:$0xff] %v296_v5  ;;  %329 = vst [vmem:[%s497_s25 + $0x68] sm:$0xff] %v297_v6  ;;  %v299_v14 = vmax.f32 %v267_v7, 0.0  ;;  %v234_v17 = vmul.f32 %v464_v0, %v195_v3  ;;  %v268_v18 = vadd.f32 %v474_v1, %v229_v10  ;;  %v269_v19 = vadd.f32 %v474_v1, %v230_v11 }
  0x1e   : > { %330 = vst [vmem:[%s497_s25 + $0x70] sm:$0xff] %v298_v9  ;;  %v270_v20 = vadd.f32 %v474_v1, %v231_v12  ;;  %v235_v21 = vmul.f32 %v464_v0, %v196_v8  ;;  %v271_v22 = vadd.f32 %v474_v1, %v232_v15  ;;  %v272_v23 = vadd.f32 %v474_v1, %v233_v16 }
  0x1f   : > { %331 = vst [vmem:[%s497_s25 + $0x78] sm:$0xff] %v299_v14  ;;  %v273_v24 = vadd.f32 %v474_v1, %v234_v17  ;;  %v236_v25 = vmul.f32 %v464_v0, %v197_v13  ;;  %v300_v29 = vmax.f32 %v268_v18, 0.0  ;;  %v301_v30 = vmax.f32 %v269_v19, 0.0 }
  0x20   : > { %v302_v31 = vmax.f32 %v270_v20, 0.0  ;;  %v274_v32 = vadd.f32 %v474_v1, %v235_v21  ;;  %v303_v36 = vmax.f32 %v271_v22, 0.0  ;;  %v304_v37 = vmax.f32 %v272_v23, 0.0 }
  0x21   : > { %v305_v38 = vmax.f32 %v273_v24, 0.0  ;;  %v275_v39 = vadd.f32 %v474_v1, %v236_v25  ;;  %332 = vst [vmem:[%s497_s25 + $0x80] sm:$0xff] %v300_v29  ;;  %333 = vst [vmem:[%s497_s25 + $0x88] sm:$0xff] %v301_v30  ;;  %v237_v42 = vmul.f32 %v464_v0, %v198_v26  ;;  %v238_v43 = vmul.f32 %v464_v0, %v199_v27 }
  0x22   : > { %334 = vst [vmem:[%s497_s25 + $0x90] sm:$0xff] %v302_v31  ;;  %v306_v41 = vmax.f32 %v274_v32, 0.0  ;;  %v239_v44 = vmul.f32 %v464_v0, %v200_v28  ;;  %335 = vst [vmem:[%s497_s25 + $0x98] sm:$0xff] %v303_v36  ;;  %v240_v47 = vmul.f32 %v464_v0, %v201_v33  ;;  %v241_v48 = vmul.f32 %v464_v0, %v202_v34 }
  0x23   : > { %336 = vst [vmem:[%s497_s25 + $0xa0] sm:$0xff] %v304_v37  ;;  %337 = vst [vmem:[%s497_s25 + $0xa8] sm:$0xff] %v305_v38  ;;  %v307_v46 = vmax.f32 %v275_v39, 0.0  ;;  %v242_v49 = vmul.f32 %v464_v0, %v203_v35  ;;  %v276_v50 = vadd.f32 %v474_v1, %v237_v42  ;;  %v277_v51 = vadd.f32 %v474_v1, %v238_v43 }
  0x24   : > { %338 = vst [vmem:[%s497_s25 + $0xb0] sm:$0xff] %v306_v41  ;;  %v278_v52 = vadd.f32 %v474_v1, %v239_v44  ;;  %v243_v53 = vmul.f32 %v464_v0, %v204_v40  ;;  %v279_v54 = vadd.f32 %v474_v1, %v240_v47  ;;  %v280_v55 = vadd.f32 %v474_v1, %v241_v48 }
  0x25   : > { %339 = vst [vmem:[%s497_s25 + $0xb8] sm:$0xff] %v307_v46  ;;  %v281_v56 = vadd.f32 %v474_v1, %v242_v49  ;;  %v244_v57 = vmul.f32 %v464_v0, %v205_v45  ;;  %v308_v58 = vmax.f32 %v276_v50, 0.0  ;;  %v309_v59 = vmax.f32 %v277_v51, 0.0 }
  0x26   : > { %v310_v60 = vmax.f32 %v278_v52, 0.0  ;;  %v282_v61 = vadd.f32 %v474_v1, %v243_v53  ;;  %v311_v62 = vmax.f32 %v279_v54, 0.0  ;;  %v312_v63 = vmax.f32 %v280_v55, 0.0 }
  0x27   : > { %v313_v2 = vmax.f32 %v281_v56, 0.0  ;;  %v283_v3 = vadd.f32 %v474_v1, %v244_v57  ;;  %340 = vst [vmem:[%s497_s25 + $0xc0] sm:$0xff] %v308_v58  ;;  %341 = vst [vmem:[%s497_s25 + $0xc8] sm:$0xff] %v309_v59 }
  0x28   : > { %342 = vst [vmem:[%s497_s25 + $0xd0] sm:$0xff] %v310_v60  ;;  %v314_v4 = vmax.f32 %v282_v61, 0.0  ;;  %343 = vst [vmem:[%s497_s25 + $0xd8] sm:$0xff] %v311_v62 }
  0x29   : > { %344 = vst [vmem:[%s497_s25 + $0xe0] sm:$0xff] %v312_v63  ;;  %345 = vst [vmem:[%s497_s25 + $0xe8] sm:$0xff] %v313_v2  ;;  %v315_v0 = vmax.f32 %v283_v3, 0.0 }
  0x2a   : > { %346 = vst [vmem:[%s497_s25 + $0xf0] sm:$0xff] %v314_v4 }
  0x2b   : > { %347 = vst [vmem:[%s497_s25 + $0xf8] sm:$0xff] %v315_v0 }
  0x2c PF: > { %s13_s12 = sadd.s32 1, %s431_s12  }
  0x2d   : > { %p10_p4 = scmp.ge.s32.totalorder %s13_s12, 4  }
  0x2f   :  { %12 = sbr.rel (!%p10_p4) target bundleno = 1 (0x1), region = 62 }

// kernel: conv_block_forward.2
= control target key start
LH: loop header
LB: loop body
LE: loop exit
PB: predicated region body
PF: predicated region fallthrough
CT: control target
= control target key end

     0   :  { %s964_s12 = smov 0   ;;  %s1177_s0 = inlined_call_operand.vmem [shape: f32[512,36], index: 0, kind: input, shape index: {}]   ;;  %s1178_s1 = inlined_call_operand.vmem [shape: f32[36,128], index: 1, kind: input, shape index: {}]   ;;  %s1179_s2 = inlined_call_operand.vmem [shape: f32[512,128], index: 2, kind: output, shape index: {0}]   ;;  %s1180_s3 = inlined_call_operand.vmem [shape: f32[16,128], index: 3, kind: output, shape index: {1}]  }
   0x1 LB: > { %s970_s13 = sadd.s32 4294967295, %s942_s12   ;;  %p782_p0 = scmp.ge.s32.totalorder %s942_s12, 1  ;;  %s942_s12 = sphi %s964_s12, %s14_s12  }
   0x2   : > { %p141_p1 = scmp.lt.s32.totalorder %s942_s12, 3 }
   0x4   : > { %p142_p2 = pnand %p782_p0, %p141_p1 }
   0x5   : > { %s783_s18 = sshll.u32 (!%p142_p2), %s970_s13, 5  ;;  %p181_p4 = scmp.lt.s32.totalorder (!%p142_p2), %s970_s13, 1 }
   0x6   : > { %145 = sbr.rel (%p142_p2) target bundleno = 298 (0x12a), region = 28  ;;  %p170_p3 = scmp.lt.s32.totalorder (!%p142_p2), %s783_s18, 63 }
   0xb   : > { %v221_v0 = vld [vmem:[%s1178_s1 + $0x20] sm:$0xf]  ;;  %vm319_vm0 = vcmask 1043456   ;;  %v220_v1 = vld [vmem:[%s1178_s1 + $0x18] sm:$0xff]  ;;  %v219_v2 = vld [vmem:[%s1178_s1 + $0x10] sm:$0xff]  ;;  %s1182_s18 = smov (!%p170_p3, %s783_s18), 63 }
   0xc   : > { %860 = vmatprep.subr.msk.mxu0 %vm319_vm0, %v221_v0  ;;  %918 = vmatprep.subr.msk.mxu1 %vm319_vm0, %v221_v0  ;;  %v218_v3 = vld [vmem:[%s1178_s1 + $0x8] sm:$0xff]  ;;  %s784_s23 = sshll.u32 %s1182_s18, 3  ;;  %vm222_vm1 = vcmask 293888   ;;  %v217_v4 = vld [vmem:[%s1178_s1] sm:$0xff]  ;;  %s1184_s13 = smov (!%p181_p4, %s970_s13), 1  ;;  %vm686_vm2 = vcmask 1040384  }
   0xd   : > { %861 = vmatpush3.msk.msra.mxu0 %vm319_vm0, %v221_v0  ;;  %923 = vmatpush3.msk.msra.mxu1 %vm319_vm0, %v221_v0  ;;  %s998_s28 = scalar_lea.vmem %s1177_s0, %s784_s23  ;;  %s1069_s4 = scalar_lea.vmem %s1179_s2, %s784_s23  ;;  %vm688_vm3 = vcmask 1041408  }
   0xe   : > { %862 = vmatprep.subr.mxu0 %v220_v1  ;;  %919 = vmatprep.subr.mxu1 %v220_v1  ;;  %v185_v5 = vld [vmem:[%s998_s28] sm:$0xff]  ;;  %v186_v6 = vld [vmem:[%s998_s28 + $0x8] sm:$0xff]  ;;  %v187_v7 = vld [vmem:[%s998_s28 + $0x10] sm:$0xff]  ;;  %s787_s5 = sshll.u32 %s1184_s13, 3 }
   0xf   : > { %863 = vmatpush3.msra.mxu0 %v220_v1  ;;  %924 = vmatpush3.msra.mxu1 %v220_v1  ;;  %v188_v8 = vld [vmem:[%s998_s28 + $0x18] sm:$0xff]  ;;  %v201_v9 = vld [vmem:[%s998_s28 + $0x80] sm:$0xff]  ;;  %v202_v10 = vld [vmem:[%s998_s28 + $0x88] sm:$0xff]  ;;  %s184_s8 = scalar_lea.vmem %s1180_s3, %s787_s5 }
  0x10   : > { %864 = vmatprep.subr.mxu0 %v219_v2  ;;  %920 = vmatprep.subr.mxu1 %v219_v2  ;;  %v189_v11 = vld [vmem:[%s998_s28 + $0x20] sm:$0xff]  ;;  %v203_v12 = vld [vmem:[%s998_s28 + $0x90] sm:$0xff]  ;;  %v204_v13 = vld [vmem:[%s998_s28 + $0x98] sm:$0xff] }
  0x11   : > { %865 = vmatpush3.msra.mxu0 %v219_v2  ;;  %925 = vmatpush3.msra.mxu1 %v219_v2  ;;  %v190_v14 = vld [vmem:[%s998_s28 + $0x28] sm:$0xff]  ;;  %v205_v15 = vld [vmem:[%s998_s28 + $0xa0] sm:$0xff]  ;;  %v191_v16 = vld [vmem:[%s998_s28 + $0x30] sm:$0xff] }
  0x12   : > { %866 = vmatprep.subr.mxu0 %v218_v3  ;;  %921 = vmatprep.subr.mxu1 %v218_v3  ;;  %v206_v17 = vld [vmem:[%s998_s28 + $0xa8] sm:$0xff]  ;;  %v192_v18 = vld [vmem:[%s998_s28 + $0x38] sm:$0xff]  ;;  %v207_v19 = vld [vmem:[%s998_s28 + $0xb0] sm:$0xff] }
  0x13   : > { %867 = vmatpush3.msra.mxu0 %v218_v3  ;;  %870 = vmatprep.mubr.msk.f32.mxu0 %vm222_vm1, %v185_v5  ;;  %v193_v20 = vld [vmem:[%s998_s28 + $0x40] sm:$0xff]  ;;  %v208_v21 = vld [vmem:[%s998_s28 + $0xb8] sm:$0xff]  ;;  %v194_v22 = vld [vmem:[%s998_s28 + $0x48] sm:$0xff] }
  0x14   : > { %868 = vmatprep.subr.mxu0 %v217_v4  ;;  %926 = vmatpush3.msra.mxu1 %v218_v3  ;;  %v209_v23 = vld [vmem:[%s998_s28 + $0xc0] sm:$0xff]  ;;  %v195_v24 = vld [vmem:[%s998_s28 + $0x50] sm:$0xff]  ;;  %v210_v25 = vld [vmem:[%s998_s28 + $0xc8] sm:$0xff] }
  0x15   : > { %869 = vmatpush3.msra.mxu0 %v217_v4  ;;  %922 = vmatprep.subr.mxu1 %v217_v4  ;;  %v196_v26 = vld [vmem:[%s998_s28 + $0x58] sm:$0xff]  ;;  %v211_v27 = vld [vmem:[%s998_s28 + $0xd0] sm:$0xff]  ;;  %v197_v28 = vld [vmem:[%s998_s28 + $0x60] sm:$0xff] }
  0x16   : > { %871 = vmatmul.mubr.msk.f32.vlgmr.msra.gmra.mxu0 %vm222_vm1, %v186_v6  ;;  %927 = vmatpush3.msra.mxu1 %v217_v4  ;;  %v212_v29 = vld [vmem:[%s998_s28 + $0xd8] sm:$0xff]  ;;  %v198_v30 = vld [vmem:[%s998_s28 + $0x68] sm:$0xff]  ;;  %v213_v31 = vld [vmem:[%s998_s28 + $0xe0] sm:$0xff] }
  0x17   : > { %873 = vmatprep.mubr.msk.f32.mxu0 %vm222_vm1, %v187_v7  ;;  %894 = vmatprep.mubr.msk.f32.mxu1 %vm222_vm1, %v201_v9  ;;  %v199_v32 = vld [vmem:[%s998_s28 + $0x70] sm:$0xff]  ;;  %v214_v33 = vld [vmem:[%s998_s28 + $0xe8] sm:$0xff]  ;;  %v200_v34 = vld [vmem:[%s998_s28 + $0x78] sm:$0xff] }
  0x18   : > { %895 = vmatmul.mubr.msk.f32.vlgmr.msra.gmra.mxu1 %vm222_vm1, %v202_v10  ;;  %v215_v35 = vld [vmem:[%s998_s28 + $0xf0] sm:$0xff]  ;;  %v216_v36 = vld [vmem:[%s998_s28 + $0xf8] sm:$0xff] }
  0x19   : > { %897 = vmatprep.mubr.msk.f32.mxu1 %vm222_vm1, %v203_v12 }
  0x1a   : > { %874 = vmatmul.mubr.msk.f32.gmra.mxu0 %vm222_vm1, %v188_v8 }
  0x1b   : > { %876 = vmatprep.mubr.msk.f32.mxu0 %vm222_vm1, %v189_v11 }
  0x1c   : > { %898 = vmatmul.mubr.msk.f32.gmra.mxu1 %vm222_vm1, %v204_v13 }
  0x1d   : > { %900 = vmatprep.mubr.msk.f32.mxu1 %vm222_vm1, %v205_v15 }
  0x1e   : > { %877 = vmatmul.mubr.msk.f32.gmra.mxu0 %vm222_vm1, %v190_v14 }
  0x1f   : > { %879 = vmatprep.mubr.msk.f32.mxu0 %vm222_vm1, %v191_v16 }
  0x20   : > { %901 = vmatmul.mubr.msk.f32.gmra.mxu1 %vm222_vm1, %v206_v17 }
  0x21   : > { %903 = vmatprep.mubr.msk.f32.mxu1 %vm222_vm1, %v207_v19 }
  0x22   : > { %880 = vmatmul.mubr.msk.f32.gmra.mxu0 %vm222_vm1, %v192_v18 }
  0x23   : > { %882 = vmatprep.mubr.msk.f32.mxu0 %vm222_vm1, %v193_v20 }
  0x24   : > { %904 = vmatmul.mubr.msk.f32.gmra.mxu1 %vm222_vm1, %v208_v21 }
  0x25   : > { %906 = vmatprep.mubr.msk.f32.mxu1 %vm222_vm1, %v209_v23 }
  0x26   : > { %883 = vmatmul.mubr.msk.f32.gmra.mxu0 %vm222_vm1, %v194_v22 }
  0x27   : > { %885 = vmatprep.mubr.msk.f32.mxu0 %vm222_vm1, %v195_v24 }
  0x28   : > { %907 = vmatmul.mubr.msk.f32.gmra.mxu1 %vm222_vm1, %v210_v25 }
  0x29   : > { %909 = vmatprep.mubr.msk.f32.mxu1 %vm222_vm1, %v211_v27 }
  0x2a   : > { %886 = vmatmul.mubr.msk.f32.gmra.mxu0 %vm222_vm1, %v196_v26 }
  0x2b   : > { %888 = vmatprep.mubr.msk.f32.mxu0 %vm222_vm1, %v197_v28 }
  0x2c   : > { %910 = vmatmul.mubr.msk.f32.gmra.mxu1 %vm222_vm1, %v212_v29 }
  0x2d   : > { %912 = vmatprep.mubr.msk.f32.mxu1 %vm222_vm1, %v213_v31 }
  0x2e   : > { %889 = vmatmul.mubr.msk.f32.gmra.mxu0 %vm222_vm1, %v198_v30 }
  0x2f   : > { %891 = vmatprep.mubr.msk.f32.mxu0 %vm222_vm1, %v199_v32 }
  0x30   : > { %913 = vmatmul.mubr.msk.f32.gmra.mxu1 %vm222_vm1, %v214_v33 }
  0x31   : > { %915 = vmatprep.mubr.msk.f32.mxu1 %vm222_vm1, %v215_v35 }
  0x32   : > { %892 = vmatmul.mubr.msk.f32.gmra.mxu0 %vm222_vm1, %v200_v34 }
  0x34   : > { %916 = vmatmul.mubr.msk.f32.gmra.mxu1 %vm222_vm1, %v216_v36 }
  0xd6   : > { %v872_v37 = vpop.f32.mrf.mxu0 }
  0xd7   : > { %549 = vst [vmem:[%s1069_s4 + $0x8] sm:$0xff] %v872_v37  ;;  %v618_v42 = vmul.f32 %v872_v37, %v872_v37 }
  0xd8   : > { %v389_v38 = vpop.f32.mrf.mxu0  ;;  %v1073_v40 = vpop.f32.mrf.mxu1 }
  0xd9   : > { %548 = vst [vmem:[%s1069_s4] sm:$0xff] %v389_v38  ;;  %v617_v39 = vmul.f32 %v389_v38, %v389_v38  ;;  %565 = vst [vmem:[%s1069_s4 + $0x88] sm:$0xff] %v1073_v40  ;;  %v580_v43 = vadd.f32 %v872_v37, %v389_v38 }
  0xda   : > { %v875_v41 = vpop.f32.mrf.mxu0  ;;  %v1078_v44 = vpop.f32.mrf.mxu1 }
  0xdb   : > { %551 = vst [vmem:[%s1069_s4 + $0x18] sm:$0xff] %v875_v41  ;;  %564 = vst [vmem:[%s1069_s4 + $0x80] sm:$0xff] %v1078_v44  ;;  %v649_v46 = vadd.f32 %v618_v42, %v617_v39  ;;  %v620_v51 = vmul.f32 %v875_v41, %v875_v41 }
  0xdc   : > { %v399_v45 = vpop.f32.mrf.mxu0  ;;  %v1083_v49 = vpop.f32.mrf.mxu1 }
  0xdd   : > { %550 = vst [vmem:[%s1069_s4 + $0x10] sm:$0xff] %v399_v45  ;;  %v581_v47 = vadd.f32 %v580_v43, %v399_v45  ;;  %v619_v48 = vmul.f32 %v399_v45, %v399_v45  ;;  %567 = vst [vmem:[%s1069_s4 + $0x98] sm:$0xff] %v1083_v49 }
  0xde   : > { %v878_v50 = vpop.f32.mrf.mxu0  ;;  %v1088_v54 = vpop.f32.mrf.mxu1 }
  0xdf   : > { %v650_v52 = vadd.f32 %v649_v46, %v619_v48  ;;  %553 = vst [vmem:[%s1069_s4 + $0x28] sm:$0xff] %v878_v50  ;;  %v582_v53 = vadd.f32 %v875_v41, %v581_v47  ;;  %566 = vst [vmem:[%s1069_s4 + $0x90] sm:$0xff] %v1088_v54  ;;  %v622_v61 = vmul.f32 %v878_v50, %v878_v50 }
  0xe0   : > { %v409_v55 = vpop.f32.mrf.mxu0  ;;  %v1093_v59 = vpop.f32.mrf.mxu1 }
  0xe1   : > { %552 = vst [vmem:[%s1069_s4 + $0x20] sm:$0xff] %v409_v55  ;;  %v583_v56 = vadd.f32 %v582_v53, %v409_v55  ;;  %v621_v57 = vmul.f32 %v409_v55, %v409_v55  ;;  %v651_v58 = vadd.f32 %v650_v52, %v620_v51  ;;  %569 = vst [vmem:[%s1069_s4 + $0xa8] sm:$0xff] %v1093_v59 }
  0xe2   : > { %v881_v60 = vpop.f32.mrf.mxu0  ;;  %v1098_v0 = vpop.f32.mrf.mxu1 }
  0xe3   : > { %v652_v62 = vadd.f32 %v651_v58, %v621_v57  ;;  %555 = vst [vmem:[%s1069_s4 + $0x38] sm:$0xff] %v881_v60  ;;  %v584_v63 = vadd.f32 %v878_v50, %v583_v56  ;;  %568 = vst [vmem:[%s1069_s4 + $0xa0] sm:$0xff] %v1098_v0  ;;  %v624_v7 = vmul.f32 %v881_v60, %v881_v60 }
  0xe4   : > { %v419_v1 = vpop.f32.mrf.mxu0  ;;  %v1103_v5 = vpop.f32.mrf.mxu1  ;;  %v633_v56 = vmul.f32 %v1078_v44, %v1078_v44  ;;  %v634_v57 = vmul.f32 %v1073_v40, %v1073_v40 }
  0xe5   : > { %554 = vst [vmem:[%s1069_s4 + $0x30] sm:$0xff] %v419_v1  ;;  %v585_v2 = vadd.f32 %v584_v63, %v419_v1  ;;  %v623_v3 = vmul.f32 %v419_v1, %v419_v1  ;;  %v653_v4 = vadd.f32 %v652_v62, %v622_v61  ;;  %571 = vst [vmem:[%s1069_s4 + $0xb8] sm:$0xff] %v1103_v5 }
  0xe6   : > { %v884_v6 = vpop.f32.mrf.mxu0  ;;  %v1108_v10 = vpop.f32.mrf.mxu1  ;;  %v635_v62 = vmul.f32 %v1088_v54, %v1088_v54  ;;  %v636_v1 = vmul.f32 %v1083_v49, %v1083_v49 }
  0xe7   : > { %v654_v8 = vadd.f32 %v653_v4, %v623_v3  ;;  %557 = vst [vmem:[%s1069_s4 + $0x48] sm:$0xff] %v884_v6  ;;  %v586_v9 = vadd.f32 %v881_v60, %v585_v2  ;;  %570 = vst [vmem:[%s1069_s4 + $0xb0] sm:$0xff] %v1108_v10  ;;  %v626_v17 = vmul.f32 %v884_v6, %v884_v6 }
  0xe8   : > { %v429_v11 = vpop.f32.mrf.mxu0  ;;  %v1113_v15 = vpop.f32.mrf.mxu1  ;;  %v637_v4 = vmul.f32 %v1098_v0, %v1098_v0 }
  0xe9   : > { %556 = vst [vmem:[%s1069_s4 + $0x40] sm:$0xff] %v429_v11  ;;  %v587_v12 = vadd.f32 %v586_v9, %v429_v11  ;;  %v625_v13 = vmul.f32 %v429_v11, %v429_v11  ;;  %v655_v14 = vadd.f32 %v654_v8, %v624_v7  ;;  %573 = vst [vmem:[%s1069_s4 + $0xc8] sm:$0xff] %v1113_v15 }
  0xea   : > { %v887_v16 = vpop.f32.mrf.mxu0  ;;  %v1118_v20 = vpop.f32.mrf.mxu1  ;;  %v639_v9 = vmul.f32 %v1108_v10, %v1108_v10 }
  0xeb   : > { %v656_v18 = vadd.f32 %v655_v14, %v625_v13  ;;  %559 = vst [vmem:[%s1069_s4 + $0x58] sm:$0xff] %v887_v16  ;;  %v588_v19 = vadd.f32 %v884_v6, %v587_v12  ;;  %572 = vst [vmem:[%s1069_s4 + $0xc0] sm:$0xff] %v1118_v20  ;;  %v628_v27 = vmul.f32 %v887_v16, %v887_v16 }
  0xec   : > { %v439_v21 = vpop.f32.mrf.mxu0  ;;  %v1123_v25 = vpop.f32.mrf.mxu1  ;;  %v641_v14 = vmul.f32 %v1118_v20, %v1118_v20 }
  0xed   : > { %558 = vst [vmem:[%s1069_s4 + $0x50] sm:$0xff] %v439_v21  ;;  %v589_v22 = vadd.f32 %v588_v19, %v439_v21  ;;  %v627_v23 = vmul.f32 %v439_v21, %v439_v21  ;;  %v657_v24 = vadd.f32 %v656_v18, %v626_v17  ;;  %575 = vst [vmem:[%s1069_s4 + $0xd8] sm:$0xff] %v1123_v25 }
  0xee   : > { %v890_v26 = vpop.f32.mrf.mxu0  ;;  %v519_v30 = vpop.f32.mrf.mxu1 }
  0xef   : > { %v658_v28 = vadd.f32 %v657_v24, %v627_v23  ;;  %561 = vst [vmem:[%s1069_s4 + $0x68] sm:$0xff] %v890_v26  ;;  %v590_v29 = vadd.f32 %v887_v16, %v589_v22  ;;  %574 = vst [vmem:[%s1069_s4 + $0xd0] sm:$0xff] %v519_v30  ;;  %v630_v37 = vmul.f32 %v890_v26, %v890_v26 }
  0xf0   : > { %v449_v31 = vpop.f32.mrf.mxu0  ;;  %v914_v35 = vpop.f32.mrf.mxu1  ;;  %v643_v19 = vmul.f32 %v519_v30, %v519_v30  ;;  %v644_v22 = vmul.f32 %v1123_v25, %v1123_v25 }
  0xf1   : > { %560 = vst [vmem:[%s1069_s4 + $0x60] sm:$0xff] %v449_v31  ;;  %v591_v32 = vadd.f32 %v590_v29, %v449_v31  ;;  %v629_v33 = vmul.f32 %v449_v31, %v449_v31  ;;  %v659_v34 = vadd.f32 %v658_v28, %v628_v27  ;;  %577 = vst [vmem:[%s1069_s4 + $0xe8] sm:$0xff] %v914_v35 }
  0xf2   : > { %v893_v36 = vpop.f32.mrf.mxu0  ;;  %v529_v41 = vpop.f32.mrf.mxu1  ;;  %v646_v27 = vmul.f32 %v914_v35, %v914_v35 }
  0xf3   : > { %v660_v38 = vadd.f32 %v659_v34, %v629_v33  ;;  %563 = vst [vmem:[%s1069_s4 + $0x78] sm:$0xff] %v893_v36  ;;  %v592_v39 = vadd.f32 %v890_v26, %v591_v32  ;;  %576 = vst [vmem:[%s1069_s4 + $0xe0] sm:$0xff] %v529_v41  ;;  %v632_v48 = vmul.f32 %v893_v36, %v893_v36 }
  0xf4   : > { %v459_v42 = vpop.f32.mrf.mxu0  ;;  %v917_v47 = vpop.f32.mrf.mxu1  ;;  %v645_v26 = vmul.f32 %v529_v41, %v529_v41 }
  0xf5   : > { %562 = vst [vmem:[%s1069_s4 + $0x70] sm:$0xff] %v459_v42  ;;  %v593_v43 = vadd.f32 %v592_v39, %v459_v42  ;;  %v631_v45 = vmul.f32 %v459_v42, %v459_v42  ;;  %v661_v46 = vadd.f32 %v660_v38, %v630_v37  ;;  %579 = vst [vmem:[%s1069_s4 + $0xf8] sm:$0xff] %v917_v47 }
  0xf6   : > { %v539_v52 = vpop.f32.mrf.mxu1  ;;  %v648_v33 = vmul.f32 %v917_v47, %v917_v47 }
  0xf7   : > { %v594_v50 = vadd.f32 %v893_v36, %v593_v43  ;;  %v662_v51 = vadd.f32 %v661_v46, %v631_v45  ;;  %578 = vst [vmem:[%s1069_s4 + $0xf0] sm:$0xff] %v539_v52  ;;  %v647_v32 = vmul.f32 %v539_v52, %v539_v52 }
  0xf9   : > { %v663_v53 = vadd.f32 %v662_v51, %v632_v48  ;;  %v595_v55 = vadd.f32 %v594_v50, %v1078_v44 }
  0xfb   : > { %v664_v58 = vadd.f32 %v663_v53, %v633_v56  ;;  %v596_v60 = vadd.f32 %v1073_v40, %v595_v55  ;;  %v638_v40 = vmul.f32 %v1093_v59, %v1093_v59 }
  0xfd   : > { %v597_v61 = vadd.f32 %v596_v60, %v1088_v54  ;;  %v665_v63 = vadd.f32 %v664_v58, %v634_v57 }
  0xff   : > { %v666_v2 = vadd.f32 %v665_v63, %v635_v62  ;;  %v598_v3 = vadd.f32 %v1083_v49, %v597_v61  ;;  %v640_v49 = vmul.f32 %v1103_v5, %v1103_v5 }
 0x101   : > { %v599_v44 = vadd.f32 %v598_v3, %v1098_v0  ;;  %v667_v6 = vadd.f32 %v666_v2, %v636_v1 }
 0x103   : > { %v668_v7 = vadd.f32 %v667_v6, %v637_v4  ;;  %v600_v8 = vadd.f32 %v1093_v59, %v599_v44  ;;  %v642_v59 = vmul.f32 %v1113_v15, %v1113_v15 }
 0x105   : > { %v601_v54 = vadd.f32 %v600_v8, %v1108_v10  ;;  %v669_v11 = vadd.f32 %v668_v7, %v638_v40 }
 0x107   : > { %v670_v12 = vadd.f32 %v669_v11, %v639_v9  ;;  %v602_v13 = vadd.f32 %v1103_v5, %v601_v54 }
 0x109   : > { %v603_v0 = vadd.f32 %v602_v13, %v1118_v20  ;;  %v671_v16 = vadd.f32 %v670_v12, %v640_v49 }
 0x10b   : > { %v672_v17 = vadd.f32 %v671_v16, %v641_v14  ;;  %v604_v18 = vadd.f32 %v1113_v15, %v603_v0 }
 0x10d   : > { %v605_v10 = vadd.f32 %v604_v18, %v519_v30  ;;  %v673_v21 = vadd.f32 %v672_v17, %v642_v59 }
 0x10f   : > { %v674_v23 = vadd.f32 %v673_v21, %v643_v19  ;;  %v606_v5 = vadd.f32 %v1123_v25, %v605_v10 }
 0x111   : > { %v607_v24 = vadd.f32 %v606_v5, %v529_v41  ;;  %v675_v20 = vadd.f32 %v674_v23, %v644_v22 }
 0x113   : > { %v676_v28 = vadd.f32 %v675_v20, %v645_v26  ;;  %v608_v29 = vadd.f32 %v914_v35, %v607_v24 }
 0x115   : > { %v609_v31 = vadd.f32 %v608_v29, %v539_v52  ;;  %v677_v15 = vadd.f32 %v676_v28, %v646_v27 }
 0x117   : > { %v610_v30 = vadd.f32 %v917_v47, %v609_v31  ;;  %v678_v34 = vadd.f32 %v677_v15, %v647_v32 }
 0x119   : > { %v611_v36 = vrot.slane %v610_v30, 4  ;;  %v679_v37 = vadd.f32 %v678_v34, %v648_v33 }
 0x11b   : > { %v612_v38 = vadd.f32 %v611_v36, %v610_v30  ;;  %v680_v39 = vrot.slane %v679_v37, 4 }
 0x11d   : > { %v613_v42 = vrot.slane %v612_v38, 2  ;;  %v681_v25 = vadd.f32 %v680_v39, %v679_v37 }
 0x11f   : > { %v614_v41 = vadd.f32 %v613_v42, %v612_v38  ;;  %v682_v43 = vrot.slane %v681_v25, 2 }
 0x121   : > { %v615_v45 = vrot.slane %v614_v41, 1  ;;  %v683_v46 = vadd.f32 %v682_v43, %v681_v25 }
 0x123   : > { %v684_v35 = vrot.slane %v683_v46, 1  ;;  %v616_v48 = vadd.f32 %v615_v45, %v614_v41 }
 0x125   : > { %v685_v50 = vadd.f32 %v684_v35, %v683_v46 }
 0x127   : > { %v687_v47 = vsel %vm686_vm2, %v616_v48, %v685_v50 }
 0x128   : > { %v689_v51 = vsel %vm688_vm3, %v687_v47, 0.0 }
 0x129   : > { %690 = vst [vmem:[%s184_s8] sm:$0xff] %v689_v51 }
 0x12a PF: > { %s14_s12 = sadd.s32 1, %s942_s12  }
 0x12b   : > { %p11_p5 = scmp.ge.s32.totalorder %s14_s12, 4  }
 0x12d   :  { %13 = sbr.rel (!%p11_p5) target bundleno = 1 (0x1), region = 70 }

</bundles_post_ra>
